<compile_context>
chip_gen: v7x
topology: tpu7x:2x2x1
jax: 0.10.0
libtpu: 0.0.40
codegen_flags: <defaults>
</compile_context>

<pallas_src>
import functools

import jax
import jax.numpy as jnp
from jax.experimental import pallas as pl
from jax.experimental.pallas import tpu as pltpu


def _policy_kernel(x_ref, w1_ref, b1_ref, w2_ref, b2_ref, state_ref, bias_ref, out_ref):
    """One (TB, ...) batch tile: MLP (bf16 matmuls, f32 acc) -> additive mask gather -> softmax."""
    # policy_net.forward(input_data): Linear -> ReLU -> Linear  (cast to bf16 in-kernel)
    x = x_ref[...].astype(jnp.bfloat16)
    h = jnp.dot(x, w1_ref[...], preferred_element_type=jnp.float32) + b1_ref[...]
    h = jnp.maximum(h, 0.0)
    logits = jnp.dot(h.astype(jnp.bfloat16), w2_ref[...],
                     preferred_element_type=jnp.float32) + b2_ref[...]

    # policy_mask[state_tensor] -> masked_fill(-1e32), fused as an additive bias gather:
    # one-hot(state) @ ((policy_mask - 1) * 1e32) on the MXU gives 0 for legal actions and
    # ~-1e32 for illegal ones; adding it to the logits reproduces masked_fill exactly and
    # removes the compare+select over (tb, A).
    tb = state_ref.shape[0]
    n_states = bias_ref.shape[0]
    iota = jax.lax.broadcasted_iota(jnp.int32, (tb, n_states), 1)
    onehot = (iota == state_ref[...]).astype(jnp.bfloat16)
    mask_bias = jnp.dot(onehot, bias_ref[...], preferred_element_type=jnp.float32)

    masked = logits + mask_bias

    # torch.softmax(x, dim=1)  (action axis == last axis)
    m = jnp.max(masked, axis=1, keepdims=True)
    e = jnp.exp(masked - m)                      # illegal lanes underflow to exactly 0
    denom = jnp.sum(e, axis=1, keepdims=True)
    out_ref[...] = (e * pl.reciprocal(denom, approx=True)).astype(out_ref.dtype)


def _round_up(n, m):
    return ((n + m - 1) // m) * m


@functools.partial(jax.jit, static_argnames=("tb", "out_dtype"))
def policy_wrapper_forward(input_data, w1, b1, w2, b2, policy_mask, state_tensor,
                           *, tb=1024, out_dtype=jnp.float32):
    """Fused PolicyWrapper forward.

    input_data  : (B, D_in) f32
    w1, b1      : (D_in, H), (1, H) or (H,)        policy_net hidden layer
    w2, b2      : (H, A),    (1, A) or (A,)        policy_net output layer
    policy_mask : (N_STATES, A) f32 in {0, 1}
    state_tensor: (B,) int32 indices into policy_mask
    returns     : (B, A) action probabilities (out_dtype; f32 by default, bf16 if the
                  consumer tolerates it -- halves the dominant HBM writeback)
    """
    B, d_in = input_data.shape
    H = w1.shape[1]
    A = w2.shape[1]
    n_states = policy_mask.shape[0]

    # Lane-dense output: pad the action dim to a multiple of 128 only if needed.
    a_pad = _round_up(A, 128)
    n_pad = _round_up(n_states, 8)

    # Small, resident operands are cast / prepared on the wrapper side (negligible HBM traffic).
    w1b = w1.astype(jnp.bfloat16)
    w2b = w2.astype(jnp.bfloat16)
    b1f = jnp.reshape(b1, (1, H)).astype(jnp.float32)
    b2f = jnp.reshape(b2, (1, A)).astype(jnp.float32)
    # Additive mask-bias table: 0 where legal, -1e32 where illegal.
    bias_tbl = (policy_mask.astype(jnp.float32) - 1.0) * jnp.float32(1e32)

    if a_pad != A:
        w2b = jnp.pad(w2b, ((0, 0), (0, a_pad - A)))
        b2f = jnp.pad(b2f, ((0, 0), (0, a_pad - A)))
        bias_tbl = jnp.pad(bias_tbl, ((0, 0), (0, a_pad - A)), constant_values=-1e32)
    if n_pad != n_states:
        bias_tbl = jnp.pad(bias_tbl, ((0, n_pad - n_states), (0, 0)))
    bias_tbl = bias_tbl.astype(jnp.bfloat16)     # {0, ~-1e32}: representable, exact-enough

    state2d = state_tensor.astype(jnp.int32).reshape(B, 1)

    # Batch tile: multiple of 8 sublanes; for B > 256 guarantee >= 2 grid steps so the
    # "parallel" batch axis shards across both TensorCores on v7x (no effect on v5e/v6e).
    tb = min(tb, _round_up(B, 8))
    if B > 256:
        tb = min(tb, _round_up(pl.cdiv(B, 2), 8))
    grid = (pl.cdiv(B, tb),)                     # ragged last block handled by Pallas

    out = pl.pallas_call(
        _policy_kernel,
        out_shape=jax.ShapeDtypeStruct((B, a_pad), out_dtype),
        grid_spec=pltpu.PrefetchScalarGridSpec(
            num_scalar_prefetch=0,
            grid=grid,
            in_specs=[
                pl.BlockSpec((tb, d_in), lambda i: (i, 0)),     # activations: tiled over batch
                pl.BlockSpec((d_in, H), lambda i: (0, 0)),      # weights resident in VMEM
                pl.BlockSpec((1, H), lambda i: (0, 0)),
                pl.BlockSpec((H, a_pad), lambda i: (0, 0)),
                pl.BlockSpec((1, a_pad), lambda i: (0, 0)),
                pl.BlockSpec((tb, 1), lambda i: (i, 0)),        # per-row state indices: tiled
                pl.BlockSpec((n_pad, a_pad), lambda i: (0, 0)), # full mask-bias table
            ],
            out_specs=pl.BlockSpec((tb, a_pad), lambda i: (i, 0)),
        ),
        compiler_params=pltpu.CompilerParams(
            dimension_semantics=("parallel",),                  # batch tiles independent
            vmem_limit_bytes=32 * 1024 * 1024,                  # safe on v5e/v6e/v7x at these tiles
        ),
    )(input_data.astype(jnp.float32), w1b, b1f, w2b, b2f, state2d, bias_tbl)

    if a_pad != A:
        out = out[:, :A]
    return out


def _reference(input_data, w1, b1, w2, b2, policy_mask, state_tensor):
    h = jnp.maximum(input_data @ w1 + jnp.reshape(b1, (1, -1)), 0.0)
    logits = h @ w2 + jnp.reshape(b2, (1, -1))
    x_mask = jnp.take(policy_mask, state_tensor, axis=0)
    masked = jnp.where(x_mask == 0.0, -1e32, logits)
    return jax.nn.softmax(masked, axis=1)


if __name__ == "__main__":
    # Small deterministic shapes; tb=128 over B=256 gives a 2-step pipelined grid.
    B, D_IN, H, A, N_STATES = 256, 32, 128, 128, 5
    TB = 128

    key = jax.random.PRNGKey(0)
    k_x, k_w1, k_b1, k_w2, k_b2, k_m, k_s = jax.random.split(key, 7)

    input_data = jax.random.normal(k_x, (B, D_IN), dtype=jnp.float32)
    w1 = jax.random.normal(k_w1, (D_IN, H), dtype=jnp.float32) * 0.1
    b1 = jax.random.normal(k_b1, (1, H), dtype=jnp.float32) * 0.1
    w2 = jax.random.normal(k_w2, (H, A), dtype=jnp.float32) * 0.1
    b2 = jax.random.normal(k_b2, (1, A), dtype=jnp.float32) * 0.1

    # Binary policy mask per state; guarantee at least one legal action per state.
    policy_mask = jax.random.bernoulli(k_m, p=0.5, shape=(N_STATES, A)).astype(jnp.float32)
    policy_mask = policy_mask.at[:, 0].set(1.0)

    state_tensor = jax.random.randint(k_s, (B,), 0, N_STATES, dtype=jnp.int32)

    out = policy_wrapper_forward(input_data, w1, b1, w2, b2, policy_mask, state_tensor, tb=TB)
    out = jax.block_until_ready(out)

    ref = _reference(input_data, w1, b1, w2, b2, policy_mask, state_tensor)
    assert out.shape == (B, A)
    # bf16 matmuls (f32 accumulation) vs a pure-f32 reference -> loosened tolerance.
    assert jnp.allclose(out, ref, atol=2e-2, rtol=0.0), "mismatch vs reference"
    # rows sum to ~1 (approx reciprocal in the normalizer -> slightly looser tolerance)
    assert jnp.allclose(jnp.sum(out, axis=1), 1.0, atol=5e-3)
    # masked (illegal) actions receive zero probability (exp underflows to exactly 0)
    x_mask = jnp.take(policy_mask, state_tensor, axis=0)
    assert float(jnp.max(jnp.where(x_mask == 0.0, out, 0.0))) < 1e-6

    print("KERNEL_OK")
</pallas_src>

<mosaic_0001>
module attributes {stable_mosaic.version = 11 : i64} {
  func.func @_policy_kernel(%arg0: i32, %arg1: memref<128x32xf32, #tpu.memory_space<vmem>>, %arg2: memref<32x128xbf16, #tpu.memory_space<vmem>>, %arg3: memref<1x128xf32, #tpu.memory_space<vmem>>, %arg4: memref<128x128xbf16, #tpu.memory_space<vmem>>, %arg5: memref<1x128xf32, #tpu.memory_space<vmem>>, %arg6: memref<128x1xi32, #tpu.memory_space<vmem>>, %arg7: memref<8x128xbf16, #tpu.memory_space<vmem>>, %arg8: memref<128x128xf32, #tpu.memory_space<vmem>>) attributes {dimension_semantics = [#tpu.dimension_semantics<parallel>], iteration_bounds = array<i64: 2>, scalar_prefetch = 0 : i64, scratch_operands = 0 : i64, tpu.core_type = #tpu.core_type<tc>, window_params = [{transform_indices = @transform_0, window_bounds = array<i64: 128, 32>}, {pipeline_mode = #tpu.pipeline_mode<synchronous>, transform_indices = @transform_1, window_bounds = array<i64: 32, 128>}, {pipeline_mode = #tpu.pipeline_mode<synchronous>, transform_indices = @transform_2, window_bounds = array<i64: 1, 128>}, {pipeline_mode = #tpu.pipeline_mode<synchronous>, transform_indices = @transform_3, window_bounds = array<i64: 128, 128>}, {pipeline_mode = #tpu.pipeline_mode<synchronous>, transform_indices = @transform_4, window_bounds = array<i64: 1, 128>}, {transform_indices = @transform_5, window_bounds = array<i64: 128, 1>}, {pipeline_mode = #tpu.pipeline_mode<synchronous>, transform_indices = @transform_6, window_bounds = array<i64: 8, 128>}, {transform_indices = @transform_7, window_bounds = array<i64: 128, 128>}]} {
    %c0 = arith.constant 0 : index
    %c0_0 = arith.constant 0 : index
    %0 = vector.load %arg1[%c0, %c0_0] : memref<128x32xf32, #tpu.memory_space<vmem>>, vector<128x32xf32>
    %1 = arith.truncf %0 : vector<128x32xf32> to vector<128x32xbf16>
    %c0_1 = arith.constant 0 : index
    %c0_2 = arith.constant 0 : index
    %2 = vector.load %arg2[%c0_1, %c0_2] : memref<32x128xbf16, #tpu.memory_space<vmem>>, vector<32x128xbf16>
    %cst = arith.constant dense<0.000000e+00> : vector<128x128xf32>
    %3 = tpu.matmul %1, %2, %cst {dimension_numbers = #tpu.dot_dimension_numbers<[1], [0], [0], [1], [0, 0, 1, 1], [], []>} : vector<128x32xbf16>, vector<32x128xbf16>, vector<128x128xf32> -> vector<128x128xf32>
    %c0_3 = arith.constant 0 : index
    %c0_4 = arith.constant 0 : index
    %4 = vector.load %arg3[%c0_3, %c0_4] : memref<1x128xf32, #tpu.memory_space<vmem>>, vector<1x128xf32>
    %5 = vector.broadcast %4 : vector<1x128xf32> to vector<128x128xf32>
    %6 = arith.addf %3, %5 : vector<128x128xf32>
    %cst_5 = arith.constant 0.000000e+00 : f32
    %7 = vector.broadcast %cst_5 : f32 to vector<128x128xf32>
    %8 = arith.maximumf %6, %7 : vector<128x128xf32>
    %9 = arith.truncf %8 : vector<128x128xf32> to vector<128x128xbf16>
    %c0_6 = arith.constant 0 : index
    %c0_7 = arith.constant 0 : index
    %10 = vector.load %arg4[%c0_6, %c0_7] : memref<128x128xbf16, #tpu.memory_space<vmem>>, vector<128x128xbf16>
    %cst_8 = arith.constant dense<0.000000e+00> : vector<128x128xf32>
    %11 = tpu.matmul %9, %10, %cst_8 {dimension_numbers = #tpu.dot_dimension_numbers<[1], [0], [0], [1], [0, 0, 1, 1], [], []>} : vector<128x128xbf16>, vector<128x128xbf16>, vector<128x128xf32> -> vector<128x128xf32>
    %c0_9 = arith.constant 0 : index
    %c0_10 = arith.constant 0 : index
    %12 = vector.load %arg5[%c0_9, %c0_10] : memref<1x128xf32, #tpu.memory_space<vmem>>, vector<1x128xf32>
    %13 = vector.broadcast %12 : vector<1x128xf32> to vector<128x128xf32>
    %14 = arith.addf %11, %13 : vector<128x128xf32>
    %15 = tpu.iota {dimensions = array<i32: 1>} : vector<128x8xi32>
    %c0_11 = arith.constant 0 : index
    %c0_12 = arith.constant 0 : index
    %16 = vector.load %arg6[%c0_11, %c0_12] : memref<128x1xi32, #tpu.memory_space<vmem>>, vector<128x1xi32>
    %17 = vector.broadcast %16 : vector<128x1xi32> to vector<128x8xi32>
    %18 = arith.cmpi eq, %15, %17 : vector<128x8xi32>
    %19 = arith.extui %18 : vector<128x8xi1> to vector<128x8xi32>
    %20 = arith.sitofp %19 : vector<128x8xi32> to vector<128x8xf32>
    %21 = arith.truncf %20 : vector<128x8xf32> to vector<128x8xbf16>
    %c0_13 = arith.constant 0 : index
    %c0_14 = arith.constant 0 : index
    %22 = vector.load %arg7[%c0_13, %c0_14] : memref<8x128xbf16, #tpu.memory_space<vmem>>, vector<8x128xbf16>
    %cst_15 = arith.constant dense<0.000000e+00> : vector<128x128xf32>
    %23 = tpu.matmul %21, %22, %cst_15 {dimension_numbers = #tpu.dot_dimension_numbers<[1], [0], [0], [1], [0, 0, 1, 1], [], []>} : vector<128x8xbf16>, vector<8x128xbf16>, vector<128x128xf32> -> vector<128x128xf32>
    %24 = arith.addf %14, %23 : vector<128x128xf32>
    %cst_16 = arith.constant dense<0xFF800000> : vector<128xf32>
    %25 = vector.multi_reduction <maximumf>, %24, %cst_16 [1] : vector<128x128xf32> to vector<128xf32>
    %26 = vector.shape_cast %25 : vector<128xf32> to vector<128x1xf32>
    %27 = vector.broadcast %26 : vector<128x1xf32> to vector<128x128xf32>
    %28 = arith.subf %24, %27 : vector<128x128xf32>
    %29 = math.exp %28 : vector<128x128xf32>
    %cst_17 = arith.constant dense<0.000000e+00> : vector<128xf32>
    %30 = vector.multi_reduction <add>, %29, %cst_17 [1] : vector<128x128xf32> to vector<128xf32>
    %31 = vector.shape_cast %30 : vector<128xf32> to vector<128x1xf32>
    %32 = tpu.reciprocal %31 {approx = true} : vector<128x1xf32> -> vector<128x1xf32>
    %33 = vector.broadcast %32 : vector<128x1xf32> to vector<128x128xf32>
    %34 = arith.mulf %29, %33 : vector<128x128xf32>
    %c0_18 = arith.constant 0 : index
    %c0_19 = arith.constant 0 : index
    %35 = vector.load %arg8[%c0_18, %c0_19] : memref<128x128xf32, #tpu.memory_space<vmem>>, vector<128x128xf32>
    tpu.vector_store %arg8[%c0_18, %c0_19], %34 {strides = array<i32>} : memref<128x128xf32, #tpu.memory_space<vmem>>, vector<128x128xf32>,
    return
  }
  func.func @transform_0(%arg0: i32) -> (i32, i32) {
    %c0_i32 = arith.constant 0 : i32
    %c0_i32_0 = arith.constant 0 : i32
    return %arg0, %c0_i32 : i32, i32
  }
  func.func @transform_1(%arg0: i32) -> (i32, i32) {
    %c0_i32 = arith.constant 0 : i32
    %c0_i32_0 = arith.constant 0 : i32
    %c0_i32_1 = arith.constant 0 : i32
    return %c0_i32, %c0_i32_0 : i32, i32
  }
  func.func @transform_2(%arg0: i32) -> (i32, i32) {
    %c0_i32 = arith.constant 0 : i32
    %c0_i32_0 = arith.constant 0 : i32
    %c0_i32_1 = arith.constant 0 : i32
    return %c0_i32, %c0_i32_0 : i32, i32
  }
  func.func @transform_3(%arg0: i32) -> (i32, i32) {
    %c0_i32 = arith.constant 0 : i32
    %c0_i32_0 = arith.constant 0 : i32
    %c0_i32_1 = arith.constant 0 : i32
    return %c0_i32, %c0_i32_0 : i32, i32
  }
  func.func @transform_4(%arg0: i32) -> (i32, i32) {
    %c0_i32 = arith.constant 0 : i32
    %c0_i32_0 = arith.constant 0 : i32
    %c0_i32_1 = arith.constant 0 : i32
    return %c0_i32, %c0_i32_0 : i32, i32
  }
  func.func @transform_5(%arg0: i32) -> (i32, i32) {
    %c0_i32 = arith.constant 0 : i32
    %c0_i32_0 = arith.constant 0 : i32
    return %arg0, %c0_i32 : i32, i32
  }
  func.func @transform_6(%arg0: i32) -> (i32, i32) {
    %c0_i32 = arith.constant 0 : i32
    %c0_i32_0 = arith.constant 0 : i32
    %c0_i32_1 = arith.constant 0 : i32
    return %c0_i32, %c0_i32_0 : i32, i32
  }
  func.func @transform_7(%arg0: i32) -> (i32, i32) {
    %c0_i32 = arith.constant 0 : i32
    %c0_i32_0 = arith.constant 0 : i32
    return %arg0, %c0_i32 : i32, i32
  }
}

</mosaic_0001>

<bundles_post_ra>
// kernel: policy_wrapper_forward.1
= control target key start
LH: loop header
LB: loop body
LE: loop exit
PB: predicated region body
PF: predicated region fallthrough
CT: control target
= control target key end

     0   :  { %12 = vsyncpa [#allocation3], 0  ;;  %s1951_s0 = inlined_call_operand.vmem [shape: f32[256,32], index: 0, kind: input, shape index: {}]   ;;  %s1952_s1 = inlined_call_operand.vmem [shape: bf16[32,128], index: 1, kind: input, shape index: {}]   ;;  %s1953_s2 = inlined_call_operand.vmem [shape: f32[1,128], index: 2, kind: input, shape index: {}]   ;;  %s1954_s3 = inlined_call_operand.vmem [shape: bf16[128,128], index: 3, kind: input, shape index: {}]   ;;  %s1955_s4 = inlined_call_operand.vmem [shape: f32[1,128], index: 4, kind: input, shape index: {}]   ;;  %s1956_s5 = inlined_call_operand.vmem [shape: s32[256,1], index: 5, kind: input, shape index: {}]   ;;  %s1957_s6 = inlined_call_operand.vmem [shape: bf16[8,128], index: 6, kind: input, shape index: {}]   ;;  %s1958_s7 = inlined_call_operand.hbm [shape: f32[256,128], index: 7, kind: output, shape index: {}]  }
   0x1   :  { %14 = vsyncpa [#allocation3 + $0x1], 0  ;;  %s1602_s24 = smov 0   ;;  %s1604_s25 = smov 0  }
   0x2   :  { %s1606_s26 = smov 0   ;;  %s1608_s27 = smov 0  }
   0x3 LB: > { %s1623_s28 = sadd.s32 4294967295, %s1555_s27   ;;  %s1177_s29 = sadd.s32 4294967294, %s1555_s27   ;;  %s1555_s27 = sphi %s1608_s27, %s1964_s27   ;;  %s1551_s26 = sphi %s1606_s26, %s1963_s26   ;;  %s1547_s25 = sphi %s1604_s25, %s1962_s25   ;;  %s1543_s24 = sphi %s1602_s24, %s1961_s24  }
   0x4   : > { %s1627_s30 = sadd.s32 1, %s1555_s27   ;;  %s184_s8 = sadd.s32 1, %s1551_s26 }
   0x5   : > { %s181_s9 = ssub.s32 %s1555_s27, %s1627_s30  ;;  %p194_p0 = scmp.ne.s32.totalorder %s1551_s26, %s1547_s25 }
   0x6   : > { %p182_p1 = scmp.eq.s32.totalorder %s181_s9, 0  ;;  %p195_p2 = scmp.eq.s32.totalorder %s1623_s28, 1 }
   0x7   : > { %p200_p3 = scmp.ne.s32.totalorder %s1547_s25, %s1543_s24  ;;  %p201_p4 = scmp.eq.s32.totalorder %s1177_s29, 1 }
   0x8   : > { %s1638_s10 = scalar_select %p182_p1, %s1551_s26, %s184_s8  }
   0x9   : > { %p1640_p5 = por %p195_p2, %p194_p0  ;;  %p1644_p6 = por %p201_p4, %p200_p3 }
   0xa   : > { %p1180_p7 = scmp.ge.s32.totalorder %s1555_s27, 1  ;;  %p252_p8 = scmp.lt.s32.totalorder %s1555_s27, 3 }
   0xc   : > { %p253_p9 = pnand %p1180_p7, %p252_p8 }
   0xd   : > { %v1419_v0 = vld [vmem:[%s1952_s1] sm:$0xff] (!%p253_p9)   ;;  %s1182_s15 = sshll.u32 (!%p253_p9), %s1623_s28, 4  ;;  %v1420_v1 = vld [vmem:[%s1952_s1 + $0x8] sm:$0xff] (!%p253_p9)   ;;  %v1557_v2 = vmov (!%p253_p9), 0   ;;  %vm350_vm0 = vcmask (!%p253_p9), 261120   ;;  %vm812_vm1 = vcmask (!%p253_p9), 1043456   ;;  %v664_v53 = vlaneseq (!%p253_p9) }
   0xe   : > { %256 = sbr.rel (%p253_p9) target bundleno = 830 (0x33e), region = 48  ;;  %p290_p10 = scmp.lt.s32.totalorder (!%p253_p9), %s1182_s15, 31  ;;  %1271 = vmatprep.subr.bf16.mxu0 (!%p253_p9), %v1419_v0  ;;  %1417 = vset.pattern.permute.xlu0 (!%p253_p9), %v1557_v2  ;;  %v786_v24 = vld [vmem:[%s1957_s6] sm:$0xf] (!%p253_p9)  ;;  %v1422_v34 = vld [vmem:[%s1954_s3 + $0x8] sm:$0xff] (!%p253_p9)   ;;  %v1423_v38 = vld [vmem:[%s1954_s3 + $0x10] sm:$0xff] (!%p253_p9)  }
   0xf   : > { %1272 = vmatpush3.bf16.msra.mxu0 (!%p253_p9), %v1419_v0  ;;  %1418 = vset.pattern.permute.xlu1 (!%p253_p9), %v1557_v2  ;;  %v1421_v25 = vld [vmem:[%s1954_s3] sm:$0xff] (!%p253_p9)   ;;  %v814_v28 = vsel (!%p253_p9), %vm812_vm1, %v786_v24, 0  ;;  %v1424_v44 = vld [vmem:[%s1954_s3 + $0x18] sm:$0xff] (!%p253_p9)   ;;  %v1426_v50 = vld [vmem:[%s1954_s3 + $0x28] sm:$0xff] (!%p253_p9)   ;;  %v1734_v54 = vand.u32 (!%p253_p9), 127, %v664_v53  ;;  %v1558_v57 = vmov (!%p253_p9), 0.0  }
  0x10   : > { %1273 = vmatprep.subr.bf16.mxu0 (!%p253_p9), %v1420_v1  ;;  %1373 = vmatprep.subr.msk.bf16.mxu1 (!%p253_p9), %vm812_vm1, %v786_v24  ;;  %v1425_v47 = vld [vmem:[%s1954_s3 + $0x20] sm:$0xff] (!%p253_p9)   ;;  %v1427_v51 = vld [vmem:[%s1954_s3 + $0x30] sm:$0xff] (!%p253_p9)   ;;  %v1428_v52 = vld [vmem:[%s1954_s3 + $0x38] sm:$0xff] (!%p253_p9)   ;;  %vm787_vm6 = vcmask (!%p253_p9), 64512   ;;  %s286_s19 = sand.u32 (!%p253_p9), 1, %s1547_s25   ;;  %s1235_s22 = sshll.u32 (!%p253_p9), %s1623_s28, 11 }
  0x11   : > { %1324 = vmatpush3.bf16.msra.mxu1 (!%p253_p9), %v814_v28  ;;  %s1181_s20 = sshll.u32 (!%p253_p9), %s286_s19, 7  ;;  %s1902_s13 = scalar_lea.hbm (!%p253_p9), %s1958_s7, %s1235_s22 }
  0x12   : > { %s1910_s14 = scalar_lea.sflag (!%p253_p9), [#allocation3], %s286_s19 }
  0x13   : > { %1274 = vmatpush3.bf16.msra.mxu0 (!%p253_p9), %v1420_v1 }
  0x14   : > { %1291 = vmatprep.subr.bf16.mxu0 (!%p253_p9), %v1421_v25 }
  0x15   : > { %s1966_s15 = smov (!%p290_p10, %s1182_s15), 31 }
  0x16   : > { %s1183_s18 = sshll.u32 %s1966_s15, 3  ;;  %s1559_s15 = smov [#allocation2]  }
  0x17   : > { %s1660_s21 = scalar_lea.vmem %s1951_s0, %s1183_s18  ;;  %s1671_s29 = scalar_lea.vmem %s1956_s5, %s1183_s18 }
  0x18   : > { %v303_v3 = vld [vmem:[%s1660_s21] sm:$0xff]  ;;  %v304_v4 = vld [vmem:[%s1660_s21 + $0x8] sm:$0xff]  ;;  %v305_v5 = vld [vmem:[%s1660_s21 + $0x10] sm:$0xff] }
  0x19   : > { %v319_v6 = vpack.c.bf16 %v304_v4, %v303_v3  ;;  %v306_v7 = vld [vmem:[%s1660_s21 + $0x18] sm:$0xff]  ;;  %v307_v8 = vld [vmem:[%s1660_s21 + $0x20] sm:$0xff]  ;;  %v308_v9 = vld [vmem:[%s1660_s21 + $0x28] sm:$0xff] }
  0x1a   : > { %v320_v10 = vpack.c.bf16 %v306_v7, %v305_v5  ;;  %v321_v11 = vpack.c.bf16 %v308_v9, %v307_v8  ;;  %v309_v12 = vld [vmem:[%s1660_s21 + $0x30] sm:$0xff]  ;;  %v310_v13 = vld [vmem:[%s1660_s21 + $0x38] sm:$0xff]  ;;  %v666_v14 = vld [vmem:[%s1671_s29] sm:$0xff] }
  0x1b   : > { %1275 = vmatprep.mubr.msk.bf16.mxu0 %vm350_vm0, %v319_v6  ;;  %v668_v15 = vld [vmem:[%s1671_s29 + $0x10] sm:$0xff]  ;;  %v311_v16 = vld [vmem:[%s1660_s21 + $0x40] sm:$0xff]  ;;  %v312_v17 = vld [vmem:[%s1660_s21 + $0x48] sm:$0xff]  ;;  %683 = vperm.xlu0 %1417, %v666_v14   ;;  %v322_v20 = vpack.c.bf16 %v310_v13, %v309_v12 }
  0x1c   : > { %1276 = vmatmul.mubr.msk.bf16.vlgmr.msra.gmra.mrb[0].mxu0 %vm350_vm0, %v320_v10  ;;  %689 = vperm.xlu1 %1418, %v668_v15   ;;  %v667_v18 = vld [vmem:[%s1671_s29 + $0x8] sm:$0xff]  ;;  %v669_v19 = vld [vmem:[%s1671_s29 + $0x18] sm:$0xff]  ;;  %v323_v21 = vpack.c.bf16 %v312_v17, %v311_v16  ;;  %v670_v23 = vld [vmem:[%s1671_s29 + $0x20] sm:$0xff] }
  0x1d   : > { %1279 = vmatprep.mubr.msk.bf16.mxu0 %vm350_vm0, %v321_v11  ;;  %v671_v22 = vld [vmem:[%s1671_s29 + $0x28] sm:$0xff]  ;;  %v313_v26 = vld [vmem:[%s1660_s21 + $0x50] sm:$0xff]  ;;  %v314_v27 = vld [vmem:[%s1660_s21 + $0x58] sm:$0xff]  ;;  %1292 = vmatpush3.bf16.msra.mxu0 %v1421_v25 }
  0x1e   : > { %v315_v29 = vld [vmem:[%s1660_s21 + $0x60] sm:$0xff]  ;;  %v316_v30 = vld [vmem:[%s1660_s21 + $0x68] sm:$0xff]  ;;  %v673_v31 = vld [vmem:[%s1671_s29 + $0x38] sm:$0xff]  ;;  %v324_v33 = vpack.c.bf16 %v314_v27, %v313_v26  ;;  %1293 = vmatprep.subr.bf16.mxu0 %v1422_v34 }
  0x1f   : > { %686 = vperm.xlu0 %1417, %v667_v18   ;;  %v672_v32 = vld [vmem:[%s1671_s29 + $0x30] sm:$0xff]  ;;  %v325_v35 = vpack.c.bf16 %v316_v30, %v315_v29  ;;  %v675_v36 = vld [vmem:[%s1671_s29 + $0x48] sm:$0xff]  ;;  %v674_v37 = vld [vmem:[%s1671_s29 + $0x40] sm:$0xff] }
  0x20   : > { %692 = vperm.xlu1 %1418, %v669_v19   ;;  %v317_v39 = vld [vmem:[%s1660_s21 + $0x70] sm:$0xff]  ;;  %v318_v40 = vld [vmem:[%s1660_s21 + $0x78] sm:$0xff]  ;;  %v679_v45 = vld [vmem:[%s1671_s29 + $0x68] sm:$0xff]  ;;  %s1866_s21 = scalar_lea.vmem [#allocation2], %s1181_s20 }
  0x21   : > { %1294 = vmatpush3.bf16.msra.mxu0 %v1422_v34  ;;  %v677_v41 = vld [vmem:[%s1671_s29 + $0x58] sm:$0xff]  ;;  %v676_v42 = vld [vmem:[%s1671_s29 + $0x50] sm:$0xff]  ;;  %v326_v43 = vpack.c.bf16 %v318_v40, %v317_v39  ;;  %v678_v46 = vld [vmem:[%s1671_s29 + $0x60] sm:$0xff]  ;;  %s1103_s23 = sshll.u32 %s1866_s21, 4  ;;  %s1904_s23 = int_to_ptr.vmem [resolvable:$true] %s1103_s23 }
  0x22   : > { %1295 = vmatprep.subr.bf16.mxu0 %v1423_v38  ;;  %v681_v48 = vld [vmem:[%s1671_s29 + $0x78] sm:$0xff]  ;;  %v680_v49 = vld [vmem:[%s1671_s29 + $0x70] sm:$0xff]  ;;  %s1493_s28 = scalar_lea.vmem %s1904_s23, 2048  ;;  %s1497_s29 = sshll.u32 %s1559_s15, 4  ;;  %s1498_s29 = int_to_ptr.vmem [resolvable:$false] %s1497_s29 }
  0x23   : > { %695 = vperm.xlu0 %1417, %v670_v23   ;;  %p1494_p11 = scmp.ne.s32.totalorder %s1904_s23, %s1493_s28  ;;  %s1499_s16 = scalar_lea.vmem %s1498_s29, 4096 }
  0x24   : > { %1280 = vmatmul.mubr.msk.bf16.gmra.mrb[4].mxu0 %vm350_vm0, %v322_v20  ;;  %698 = vperm.xlu1 %1418, %v671_v22   ;;  %p1500_p0 = scmp.lt.s32.totalorder %s1904_s23, %s1498_s29  ;;  %p1501_p1 = scmp.lt.s32.totalorder %s1499_s16, %s1493_s28 }
  0x25   : > { %1283 = vmatprep.mubr.msk.bf16.mxu0 %vm350_vm0, %v323_v21  ;;  %1296 = vmatpush3.bf16.msra.mxu0 %v1423_v38  ;;  %p1495_p12 = pnand %p1494_p11, %p1640_p5 }
  0x26   : > { %1297 = vmatprep.subr.bf16.mxu0 %v1424_v44  ;;  %p1502_p2 = por %p1501_p1, %p1500_p0 }
  0x27   : > { %701 = vperm.xlu0 %1417, %v672_v32   ;;  %v1186_v32 = vld [vmem:[%s1953_s2] ss:$0 sm:$0xff]  ;;  %p1496_p13 = pneg %p1495_p12 }
  0x28   : > { %704 = vperm.xlu1 %1418, %v673_v31  }
  0x29   : > { %1298 = vmatpush3.bf16.msra.mxu0 %v1424_v44  ;;  %p1503_p3 = pnand %p1502_p2, %p1496_p13 }
  0x2a   : > { %1299 = vmatprep.subr.bf16.mxu0 %v1425_v47 }
  0x2b   : > { %707 = vperm.xlu0 %1417, %v674_v37  }
  0x2c   : > { %1284 = vmatmul.mubr.msk.bf16.gmra.mrb[8].mxu0 %vm350_vm0, %v324_v33  ;;  %710 = vperm.xlu1 %1418, %v675_v36  }
  0x2d   : > { %1287 = vmatprep.mubr.msk.bf16.mxu0 %vm350_vm0, %v325_v35  ;;  %1300 = vmatpush3.bf16.msra.mxu0 %v1425_v47 }
  0x2e   : > { %1301 = vmatprep.subr.bf16.mxu0 %v1426_v50 }
  0x2f   : > { %713 = vperm.xlu0 %1417, %v676_v42  }
  0x30   : > { %716 = vperm.xlu1 %1418, %v677_v41  }
  0x31   : > { %1302 = vmatpush3.bf16.msra.mxu0 %v1426_v50 }
  0x32   : > { %1303 = vmatprep.subr.bf16.mxu0 %v1427_v51 }
  0x33   : > { %719 = vperm.xlu0 %1417, %v678_v46  }
  0x34   : > { %1288 = vmatmul.mubr.msk.bf16.gmra.mrb[12].mxu0 %vm350_vm0, %v326_v43  ;;  %722 = vperm.xlu1 %1418, %v679_v45  }
  0x35   : > { %1304 = vmatpush3.bf16.msra.mxu0 %v1427_v51 }
  0x36   : > { %1305 = vmatprep.subr.bf16.mxu0 %v1428_v52 }
  0x37   : > { %725 = vperm.xlu0 %1417, %v680_v49  }
  0x38   : > { %728 = vperm.xlu1 %1418, %v681_v48  }
  0x39   : > { %1306 = vmatpush3.bf16.msra.mxu0 %v1428_v52 }
  0x9a   : > { %v684_v55 = vpop.permute.xlu0 %683 }
  0x9b   : > { %v690_v56 = vpop.permute.xlu1 %689  ;;  %vm730_vm2 = vcmp.eq.s32.totalorder %v1734_v54, %v684_v55 }
  0x9c   : > { %vm732_vm3 = vcmp.eq.s32.totalorder %v1734_v54, %v690_v56  ;;  %v1206_v58 = vsel %vm730_vm2, 1.0, %v1558_v57 }
  0x9d   : > { %v1208_v59 = vsel %vm732_vm3, 1.0, %v1558_v57 }
  0x9e   : > { %v687_v60 = vpop.permute.xlu0 %686 }
  0x9f   : > { %v693_v61 = vpop.permute.xlu1 %692  ;;  %vm731_vm4 = vcmp.eq.s32.totalorder %v1734_v54, %v687_v60 }
  0xa0   : > { %vm733_vm5 = vcmp.eq.s32.totalorder %v1734_v54, %v693_v61  ;;  %v1207_v62 = vsel %vm731_vm4, 1.0, %v1558_v57 }
  0xa1   : > { %v1209_v63 = vsel %vm733_vm5, 1.0, %v1558_v57  ;;  %v778_v1 = vpack.c.bf16 %v1207_v62, %v1206_v58 }
  0xa2   : > { %v779_v0 = vpack.c.bf16 %v1209_v63, %v1208_v59  ;;  %v696_v3 = vpop.permute.xlu0 %695 }
  0xa3   : > { %v699_v2 = vpop.permute.xlu1 %698  ;;  %1325 = vmatprep.mubr.msk.bf16.mxu1 %vm787_vm6, %v778_v1  ;;  %vm734_vm8 = vcmp.eq.s32.totalorder %v1734_v54, %v696_v3 }
  0xa4   : > { %vm735_vm7 = vcmp.eq.s32.totalorder %v1734_v54, %v699_v2  ;;  %v1210_v5 = vsel %vm734_vm8, 1.0, %v1558_v57  ;;  %1326 = vmatmul.mubr.msk.bf16.vlgmr.msra.gmra.mrb[0].mxu1 %vm787_vm6, %v779_v0 }
  0xa5   : > { %v1211_v4 = vsel %vm735_vm7, 1.0, %v1558_v57 }
  0xa6   : > { %v780_v6 = vpack.c.bf16 %v1211_v4, %v1210_v5  ;;  %v702_v8 = vpop.permute.xlu0 %701 }
  0xa7   : > { %v705_v7 = vpop.permute.xlu1 %704  ;;  %vm736_vm10 = vcmp.eq.s32.totalorder %v1734_v54, %v702_v8 }
  0xa8   : > { %vm737_vm9 = vcmp.eq.s32.totalorder %v1734_v54, %v705_v7  ;;  %1329 = vmatprep.mubr.msk.bf16.mxu1 %vm787_vm6, %v780_v6  ;;  %v1212_v10 = vsel %vm736_vm10, 1.0, %v1558_v57 }
  0xa9   : > { %v1213_v9 = vsel %vm737_vm9, 1.0, %v1558_v57 }
  0xaa   : > { %v781_v11 = vpack.c.bf16 %v1213_v9, %v1212_v10  ;;  %v708_v13 = vpop.permute.xlu0 %707 }
  0xab   : > { %v711_v12 = vpop.permute.xlu1 %710  ;;  %vm738_vm12 = vcmp.eq.s32.totalorder %v1734_v54, %v708_v13 }
  0xac   : > { %vm739_vm11 = vcmp.eq.s32.totalorder %v1734_v54, %v711_v12  ;;  %v1214_v15 = vsel %vm738_vm12, 1.0, %v1558_v57  ;;  %1330 = vmatmul.mubr.msk.bf16.gmra.mrb[4].mxu1 %vm787_vm6, %v781_v11 }
  0xad   : > { %v1215_v14 = vsel %vm739_vm11, 1.0, %v1558_v57 }
  0xae   : > { %v782_v16 = vpack.c.bf16 %v1215_v14, %v1214_v15  ;;  %v714_v18 = vpop.permute.xlu0 %713 }
  0xaf   : > { %v717_v17 = vpop.permute.xlu1 %716  ;;  %vm740_vm14 = vcmp.eq.s32.totalorder %v1734_v54, %v714_v18 }
  0xb0   : > { %vm741_vm13 = vcmp.eq.s32.totalorder %v1734_v54, %v717_v17  ;;  %1333 = vmatprep.mubr.msk.bf16.mxu1 %vm787_vm6, %v782_v16  ;;  %v1216_v20 = vsel %vm740_vm14, 1.0, %v1558_v57 }
  0xb1   : > { %v1217_v19 = vsel %vm741_vm13, 1.0, %v1558_v57 }
  0xb2   : > { %v783_v21 = vpack.c.bf16 %v1217_v19, %v1216_v20  ;;  %v720_v23 = vpop.permute.xlu0 %719 }
  0xb3   : > { %v723_v22 = vpop.permute.xlu1 %722  ;;  %vm742_vm0 = vcmp.eq.s32.totalorder %v1734_v54, %v720_v23 }
  0xb4   : > { %vm743_vm15 = vcmp.eq.s32.totalorder %v1734_v54, %v723_v22  ;;  %v1218_v25 = vsel %vm742_vm0, 1.0, %v1558_v57  ;;  %1334 = vmatmul.mubr.msk.bf16.gmra.mrb[8].mxu1 %vm787_vm6, %v783_v21 }
  0xb5   : > { %v1219_v24 = vsel %vm743_vm15, 1.0, %v1558_v57 }
  0xb6   : > { %v784_v26 = vpack.c.bf16 %v1219_v24, %v1218_v25  ;;  %v726_v28 = vpop.permute.xlu0 %725 }
  0xb7   : > { %v729_v27 = vpop.permute.xlu1 %728  ;;  %vm744_vm2 = vcmp.eq.s32.totalorder %v1734_v54, %v726_v28 }
  0xb8   : > { %vm745_vm1 = vcmp.eq.s32.totalorder %v1734_v54, %v729_v27  ;;  %1337 = vmatprep.mubr.msk.bf16.mxu1 %vm787_vm6, %v784_v26  ;;  %v1220_v30 = vsel %vm744_vm2, 1.0, %v1558_v57 }
  0xb9   : > { %v1221_v29 = vsel %vm745_vm1, 1.0, %v1558_v57 }
  0xba   : > { %v785_v31 = vpack.c.bf16 %v1221_v29, %v1220_v30 }
  0xbc   : > { %1338 = vmatmul.mubr.msk.bf16.gmra.mrb[12].mxu1 %vm787_vm6, %v785_v31 }
  0xef   : > { %v1277_v33 = vpop.f32.mrb[0].mxu0 }
  0xf0   : > { %v418_v34 = vadd.f32 %v1277_v33, %v1186_v32  ;;  %v409_v35 = vpop.f32.mrb[1].mxu0 }
  0xf1   : > { %v410_v36 = vadd.f32 %v1186_v32, %v409_v35  ;;  %v1278_v37 = vpop.f32.mrb[2].mxu0 }
  0xf2   : > { %v421_v38 = vadd.f32 %v1278_v37, %v1186_v32  ;;  %v412_v39 = vpop.f32.mrb[3].mxu0  ;;  %v474_v41 = vmax.f32 %v418_v34, 0.0 }
  0xf3   : > { %v413_v40 = vadd.f32 %v1186_v32, %v412_v39  ;;  %v472_v43 = vmax.f32 %v410_v36, 0.0 }
  0xf4   : > { %v475_v42 = vmax.f32 %v421_v38, 0.0 }
  0xf5   : > { %v473_v44 = vmax.f32 %v413_v40, 0.0 }
  0xf6   : > { %v489_v45 = vpack.c.bf16 %v475_v42, %v474_v41  ;;  %v1197_v41 = vld [vmem:[%s1955_s4] ss:$0 sm:$0xff] }
  0xf7   : > { %v488_v46 = vpack.c.bf16 %v473_v44, %v472_v43  ;;  %v1281_v47 = vpop.f32.mrb[4].mxu0 }
  0xf8   : > { %v434_v48 = vadd.f32 %v1281_v47, %v1186_v32  ;;  %v425_v49 = vpop.f32.mrb[5].mxu0 }
  0xf9   : > { %v426_v50 = vadd.f32 %v1186_v32, %v425_v49  ;;  %v1282_v51 = vpop.f32.mrb[6].mxu0  ;;  %1307 = vmatprep.mubr.bf16.mxu0 %v488_v46 }
  0xfa   : > { %v478_v52 = vmax.f32 %v434_v48, 0.0  ;;  %v437_v53 = vadd.f32 %v1282_v51, %v1186_v32  ;;  %v428_v54 = vpop.f32.mrb[7].mxu0  ;;  %1308 = vmatmul.mubr.bf16.vlgmr.msra.gmra.mrb[16].mxu0 %v489_v45 }
  0xfb   : > { %v476_v55 = vmax.f32 %v426_v50, 0.0  ;;  %v429_v56 = vadd.f32 %v1186_v32, %v428_v54 }
  0xfc   : > { %v479_v57 = vmax.f32 %v437_v53, 0.0 }
  0xfd   : > { %v477_v58 = vmax.f32 %v429_v56, 0.0 }
  0xfe   : > { %v491_v59 = vpack.c.bf16 %v479_v57, %v478_v52 }
  0xff   : > { %v490_v60 = vpack.c.bf16 %v477_v58, %v476_v55  ;;  %v1285_v61 = vpop.f32.mrb[8].mxu0 }
 0x100   : > { %v450_v62 = vadd.f32 %v1285_v61, %v1186_v32  ;;  %v441_v63 = vpop.f32.mrb[9].mxu0 }
 0x101   : > { %v442_v0 = vadd.f32 %v1186_v32, %v441_v63  ;;  %v1286_v1 = vpop.f32.mrb[10].mxu0  ;;  %1311 = vmatprep.mubr.bf16.mxu0 %v490_v60 }
 0x102   : > { %v482_v2 = vmax.f32 %v450_v62, 0.0  ;;  %v453_v3 = vadd.f32 %v1286_v1, %v1186_v32  ;;  %v444_v4 = vpop.f32.mrb[11].mxu0  ;;  %1312 = vmatmul.mubr.bf16.gmra.mrb[20].mxu0 %v491_v59 }
 0x103   : > { %v480_v5 = vmax.f32 %v442_v0, 0.0  ;;  %v445_v6 = vadd.f32 %v1186_v32, %v444_v4 }
 0x104   : > { %v483_v7 = vmax.f32 %v453_v3, 0.0 }
 0x105   : > { %v481_v8 = vmax.f32 %v445_v6, 0.0 }
 0x106   : > { %v493_v9 = vpack.c.bf16 %v483_v7, %v482_v2 }
 0x107   : > { %v492_v10 = vpack.c.bf16 %v481_v8, %v480_v5  ;;  %v1289_v11 = vpop.f32.mrb[12].mxu0 }
 0x108   : > { %v466_v12 = vadd.f32 %v1289_v11, %v1186_v32  ;;  %v457_v13 = vpop.f32.mrb[13].mxu0 }
 0x109   : > { %v458_v14 = vadd.f32 %v1186_v32, %v457_v13  ;;  %v1290_v15 = vpop.f32.mrb[14].mxu0  ;;  %1315 = vmatprep.mubr.bf16.mxu0 %v492_v10 }
 0x10a   : > { %v486_v16 = vmax.f32 %v466_v12, 0.0  ;;  %v469_v17 = vadd.f32 %v1290_v15, %v1186_v32  ;;  %v460_v18 = vpop.f32.mrb[15].mxu0  ;;  %1316 = vmatmul.mubr.bf16.gmra.mrb[24].mxu0 %v493_v9 }
 0x10b   : > { %v484_v19 = vmax.f32 %v458_v14, 0.0  ;;  %v461_v20 = vadd.f32 %v1186_v32, %v460_v18 }
 0x10c   : > { %v487_v21 = vmax.f32 %v469_v17, 0.0 }
 0x10d   : > { %v485_v22 = vmax.f32 %v461_v20, 0.0 }
 0x10e   : > { %v495_v23 = vpack.c.bf16 %v487_v21, %v486_v16 }
 0x10f   : > { %v494_v24 = vpack.c.bf16 %v485_v22, %v484_v19 }
 0x111   : > { %1319 = vmatprep.mubr.bf16.mxu0 %v494_v24 }
 0x112   : > { %1320 = vmatmul.mubr.bf16.gmra.mrb[28].mxu0 %v495_v23 }
 0x177   : > { %v1327_v25 = vpop.f32.mrb[0].mxu1 }
 0x178   : > { %v850_v26 = vpop.f32.mrb[1].mxu1 }
 0x179   : > { %v1328_v27 = vpop.f32.mrb[2].mxu1 }
 0x17a   : > { %v853_v28 = vpop.f32.mrb[3].mxu1 }
 0x17f   : > { %v1331_v29 = vpop.f32.mrb[4].mxu1 }
 0x180   : > { %v866_v30 = vpop.f32.mrb[5].mxu1 }
 0x181   : > { %v1332_v31 = vpop.f32.mrb[6].mxu1 }
 0x182   : > { %v869_v33 = vpop.f32.mrb[7].mxu1 }
 0x187   : > { %v1335_v34 = vpop.f32.mrb[8].mxu1 }
 0x188   : > { %v882_v35 = vpop.f32.mrb[9].mxu1 }
 0x189   : > { %v1336_v36 = vpop.f32.mrb[10].mxu1 }
 0x18a   : > { %v885_v37 = vpop.f32.mrb[11].mxu1 }
 0x18f   : > { %v1339_v38 = vpop.f32.mrb[12].mxu1 }
 0x190   : > { %v898_v32 = vpop.f32.mrb[13].mxu1 }
 0x191   : > { %v1340_v39 = vpop.f32.mrb[14].mxu1 }
 0x192   : > { %v901_v40 = vpop.f32.mrb[15].mxu1 }
 0x1cd   : > { %v1309_v42 = vpop.f32.mrb[16].mxu0 }
 0x1ce   : > { %v610_v43 = vadd.f32 %v1309_v42, %v1197_v41  ;;  %v601_v44 = vpop.f32.mrb[17].mxu0 }
 0x1cf   : > { %v602_v45 = vadd.f32 %v1197_v41, %v601_v44  ;;  %v1310_v46 = vpop.f32.mrb[18].mxu0 }
 0x1d0   : > { %v613_v47 = vadd.f32 %v1310_v46, %v1197_v41  ;;  %v604_v48 = vpop.f32.mrb[19].mxu0  ;;  %v915_v49 = vadd.f32 %v1327_v25, %v610_v43 }
 0x1d1   : > { %v605_v50 = vadd.f32 %v1197_v41, %v604_v48  ;;  %v913_v51 = vadd.f32 %v850_v26, %v602_v45 }
 0x1d2   : > { %933 = vmax.xlane.f32.xlu0 %v915_v49  ;;  %v1766_v52 = vadd.f32 %v1328_v27, %v613_v47 }
 0x1d3   : > { %v1768_v53 = vadd.f32 %v853_v28, %v605_v50 }
 0x1d5   : > { %v1313_v54 = vpop.f32.mrb[20].mxu0  ;;  %931 = vmax.xlane.f32.xlu1 %v1768_v53 }
 0x1d6   : > { %v626_v55 = vadd.f32 %v1313_v54, %v1197_v41  ;;  %v617_v56 = vpop.f32.mrb[21].mxu0  ;;  %929 = vmax.xlane.f32.xlu0 %v913_v51 }
 0x1d7   : > { %v618_v57 = vadd.f32 %v1197_v41, %v617_v56  ;;  %v1314_v58 = vpop.f32.mrb[22].mxu0 }
 0x1d8   : > { %v629_v59 = vadd.f32 %v1314_v58, %v1197_v41  ;;  %v620_v60 = vpop.f32.mrb[23].mxu0  ;;  %v919_v61 = vadd.f32 %v1331_v29, %v626_v55 }
 0x1d9   : > { %v621_v62 = vadd.f32 %v1197_v41, %v620_v60  ;;  %v1771_v63 = vadd.f32 %v866_v30, %v618_v57 }
 0x1da   : > { %941 = vmax.xlane.f32.xlu1 %v919_v61  ;;  %935 = vmax.xlane.f32.xlu0 %v1766_v52  ;;  %v1774_v0 = vadd.f32 %v1332_v31, %v629_v59 }
 0x1db   : > { %v1776_v1 = vadd.f32 %v869_v33, %v621_v62 }
 0x1dd   : > { %v1317_v2 = vpop.f32.mrb[24].mxu0 }
 0x1de   : > { %v642_v3 = vadd.f32 %v1317_v2, %v1197_v41  ;;  %v633_v4 = vpop.f32.mrb[25].mxu0  ;;  %937 = vmax.xlane.f32.xlu1 %v1771_v63  ;;  %943 = vmax.xlane.f32.xlu0 %v1774_v0 }
 0x1df   : > { %v634_v5 = vadd.f32 %v1197_v41, %v633_v4  ;;  %v1318_v6 = vpop.f32.mrb[26].mxu0 }
 0x1e0   : > { %v645_v7 = vadd.f32 %v1318_v6, %v1197_v41  ;;  %v636_v8 = vpop.f32.mrb[27].mxu0  ;;  %v923_v9 = vadd.f32 %v1335_v34, %v642_v3 }
 0x1e1   : > { %v637_v10 = vadd.f32 %v1197_v41, %v636_v8  ;;  %v1780_v11 = vadd.f32 %v882_v35, %v634_v5 }
 0x1e2   : > { %949 = vmax.xlane.f32.xlu1 %v923_v9  ;;  %939 = vmax.xlane.f32.xlu0 %v1776_v1  ;;  %v1783_v12 = vadd.f32 %v1336_v36, %v645_v7 }
 0x1e3   : > { %v1785_v13 = vadd.f32 %v885_v37, %v637_v10 }
 0x1e5   : > { %v1321_v14 = vpop.f32.mrb[28].mxu0 }
 0x1e6   : > { %v658_v15 = vadd.f32 %v1321_v14, %v1197_v41  ;;  %v649_v16 = vpop.f32.mrb[29].mxu0  ;;  %945 = vmax.xlane.f32.xlu1 %v1780_v11  ;;  %951 = vmax.xlane.f32.xlu0 %v1783_v12 }
 0x1e7   : > { %v650_v17 = vadd.f32 %v1197_v41, %v649_v16  ;;  %v1322_v18 = vpop.f32.mrb[30].mxu0 }
 0x1e8   : > { %v661_v19 = vadd.f32 %v1322_v18, %v1197_v41  ;;  %v652_v20 = vpop.f32.mrb[31].mxu0  ;;  %v1789_v21 = vadd.f32 %v1339_v38, %v658_v15 }
 0x1e9   : > { %v653_v22 = vadd.f32 %v1197_v41, %v652_v20  ;;  %v1791_v23 = vadd.f32 %v898_v32, %v650_v17 }
 0x1ea   : > { %947 = vmax.xlane.f32.xlu0 %v1785_v13  ;;  %v1794_v24 = vadd.f32 %v1340_v39, %v661_v19 }
 0x1eb   : > { %953 = vmax.xlane.f32.xlu1 %v1791_v23  ;;  %v1797_v25 = vadd.f32 %v901_v40, %v653_v22 }
 0x1ee   : > { %955 = vmax.xlane.f32.xlu0 %v1797_v25 }
 0x1ef   : > { %957 = vmax.xlane.f32.xlu1 %v1789_v21 }
 0x1f2   : > { %959 = vmax.xlane.f32.xlu0 %v1794_v24 }
 0x25f   : > { %v934_v26 = vpop.xlane.xlu0 %933 }
 0x260   : > { %v963_v27 = vsub.f32 %v915_v49, %v934_v26 }
 0x262   : > { %v981_v28 = vmul.f32 1.442695, %v963_v27  ;;  %v932_v29 = vpop.xlane.xlu1 %931 }
 0x263   : > { %v930_v30 = vpop.xlane.xlu0 %929  ;;  %v962_v38 = vsub.f32 %v1768_v53, %v932_v29 }
 0x264   : > { %1429 = vpow2.f32 %v981_v28  ;;  %v961_v31 = vsub.f32 %v913_v51, %v930_v30 }
 0x265   : > { %v979_v43 = vmul.f32 1.442695, %v962_v38 }
 0x266   : > { %v977_v33 = vmul.f32 1.442695, %v961_v31 }
 0x267   : > { %v942_v34 = vpop.xlane.xlu1 %941  ;;  %v936_v35 = vpop.xlane.xlu0 %935 }
 0x268   : > { %1431 = vpow2.f32 %v977_v33  ;;  %v967_v36 = vsub.f32 %v919_v61, %v942_v34  ;;  %v964_v37 = vsub.f32 %v1766_v52, %v936_v35 }
 0x26a   : > { %v989_v32 = vmul.f32 1.442695, %v967_v36  ;;  %v983_v39 = vmul.f32 1.442695, %v964_v37 }
 0x26b   : > { %v938_v40 = vpop.xlane.xlu1 %937  ;;  %v944_v41 = vpop.xlane.xlu0 %943 }
 0x26c   : > { %1433 = vpow2.f32 %v989_v32  ;;  %v965_v42 = vsub.f32 %v1771_v63, %v938_v40  ;;  %v968_v44 = vsub.f32 %v1774_v0, %v944_v41 }
 0x26d   : > { %1435 = vpow2.f32 %v983_v39 }
 0x26e   : > { %v1806_v45 = vpop.eup %1429  ;;  %v985_v46 = vmul.f32 1.442695, %v965_v42  ;;  %v991_v50 = vmul.f32 1.442695, %v968_v44 }
 0x26f   : > { %1013 = vadd.xlane.f32.xlu1 %v1806_v45  ;;  %v950_v47 = vpop.xlane.xlu1 %949  ;;  %v940_v48 = vpop.xlane.xlu0 %939 }
 0x270   : > { %1437 = vpow2.f32 %v985_v46  ;;  %v971_v49 = vsub.f32 %v923_v9, %v950_v47  ;;  %v966_v51 = vsub.f32 %v1776_v1, %v940_v48 }
 0x271   : > { %1439 = vpow2.f32 %v979_v43 }
 0x272   : > { %v1810_v52 = vpop.eup %1431  ;;  %v997_v53 = vmul.f32 1.442695, %v971_v49  ;;  %v987_v58 = vmul.f32 1.442695, %v966_v51 }
 0x273   : > { %v946_v54 = vpop.xlane.xlu1 %945  ;;  %1009 = vadd.xlane.f32.xlu1 %v1810_v52  ;;  %v952_v55 = vpop.xlane.xlu0 %951 }
 0x274   : > { %1441 = vpow2.f32 %v997_v53  ;;  %v969_v56 = vsub.f32 %v1780_v11, %v946_v54  ;;  %v972_v57 = vsub.f32 %v1783_v12, %v952_v55 }
 0x275   : > { %1443 = vpow2.f32 %v991_v50 }
 0x276   : > { %v1815_v59 = vpop.eup %1433  ;;  %v993_v60 = vmul.f32 1.442695, %v969_v56  ;;  %v999_v63 = vmul.f32 1.442695, %v972_v57 }
 0x277   : > { %v1817_v61 = vpop.eup %1435  ;;  %1021 = vadd.xlane.f32.xlu1 %v1815_v59  ;;  %v948_v62 = vpop.xlane.xlu0 %947 }
 0x278   : > { %1445 = vpow2.f32 %v993_v60  ;;  %1015 = vadd.xlane.f32.xlu0 %v1817_v61  ;;  %v970_v0 = vsub.f32 %v1785_v13, %v948_v62  ;;  %v954_v1 = vpop.xlane.xlu1 %953 }
 0x279   : > { %1447 = vpow2.f32 %v987_v58  ;;  %v973_v2 = vsub.f32 %v1791_v23, %v954_v1 }
 0x27a   : > { %v1823_v3 = vpop.eup %1437  ;;  %1449 = vpow2.f32 %v999_v63  ;;  %v995_v7 = vmul.f32 1.442695, %v970_v0 }
 0x27b   : > { %v1825_v4 = vpop.eup %1439  ;;  %v1001_v5 = vmul.f32 1.442695, %v973_v2  ;;  %1017 = vadd.xlane.f32.xlu1 %v1823_v3  ;;  %v956_v6 = vpop.xlane.xlu0 %955 }
 0x27c   : > { %1011 = vadd.xlane.f32.xlu0 %v1825_v4  ;;  %v958_v8 = vpop.xlane.xlu1 %957  ;;  %v974_v9 = vsub.f32 %v1797_v25, %v956_v6 }
 0x27d   : > { %1451 = vpow2.f32 %v1001_v5  ;;  %v975_v10 = vsub.f32 %v1789_v21, %v958_v8 }
 0x27e   : > { %v1831_v11 = vpop.eup %1441  ;;  %1453 = vpow2.f32 %v995_v7  ;;  %v1003_v15 = vmul.f32 1.442695, %v974_v9 }
 0x27f   : > { %v1833_v12 = vpop.eup %1443  ;;  %v1005_v13 = vmul.f32 1.442695, %v975_v10  ;;  %1029 = vadd.xlane.f32.xlu1 %v1831_v11  ;;  %v960_v14 = vpop.xlane.xlu0 %959 }
 0x280   : > { %1023 = vadd.xlane.f32.xlu0 %v1833_v12  ;;  %v976_v16 = vsub.f32 %v1794_v24, %v960_v14 }
 0x281   : > { %1455 = vpow2.f32 %v1005_v13 }
 0x282   : > { %v1838_v17 = vpop.eup %1445  ;;  %1457 = vpow2.f32 %v1003_v15  ;;  %v1007_v19 = vmul.f32 1.442695, %v976_v16 }
 0x283   : > { %v1840_v18 = vpop.eup %1447  ;;  %1025 = vadd.xlane.f32.xlu1 %v1838_v17 }
 0x284   : > { %1019 = vadd.xlane.f32.xlu0 %v1840_v18  ;;  %v1844_v20 = vpop.eup %1449  ;;  %1459 = vpow2.f32 %v1007_v19 }
 0x287   : > { %v1846_v21 = vpop.eup %1451 }
 0x288   : > { %1031 = vadd.xlane.f32.xlu0 %v1844_v20  ;;  %1033 = vadd.xlane.f32.xlu1 %v1846_v21  ;;  %v1850_v22 = vpop.eup %1453 }
 0x28b   : > { %v1852_v23 = vpop.eup %1455 }
 0x28c   : > { %1027 = vadd.xlane.f32.xlu0 %v1850_v22  ;;  %1037 = vadd.xlane.f32.xlu1 %v1852_v23  ;;  %v1856_v24 = vpop.eup %1457 }
 0x28e   : > { %v1859_v25 = vpop.eup %1459 }
 0x290   : > { %1035 = vadd.xlane.f32.xlu0 %v1856_v24 }
 0x294   : > { %1039 = vadd.xlane.f32.xlu0 %v1859_v25 }
 0x2fc   : > { %v1014_v26 = vpop.xlane.xlu1 %1013 }
 0x2fd   : > { %1461 = vrcp.f32 %v1014_v26 }
 0x300   : > { %v1010_v27 = vpop.xlane.xlu1 %1009 }
 0x301   : > { %1463 = vrcp.f32 %v1010_v27 }
 0x304   : > { %v1022_v28 = vpop.xlane.xlu1 %1021 }
 0x305   : > { %1465 = vrcp.f32 %v1022_v28  ;;  %v1016_v29 = vpop.xlane.xlu0 %1015 }
 0x306   : > { %1467 = vrcp.f32 %v1016_v29 }
 0x307   : > { %v1462_v30 = vpop.eup %1461 }
 0x308   : > { %v1059_v31 = vmul.f32 %v1462_v30, %v1806_v45  ;;  %v1018_v33 = vpop.xlane.xlu1 %1017 }
 0x309   : > { %1469 = vrcp.f32 %v1018_v33  ;;  %v1012_v34 = vpop.xlane.xlu0 %1011 }
 0x30a   : > { %1075 = vst [vmem:[%s1866_s21 + $0x10] sm:$0xff] %v1059_v31  ;;  %1471 = vrcp.f32 %v1012_v34 }
 0x30b   : > { %v1464_v35 = vpop.eup %1463 }
 0x30c   : > { %v1057_v36 = vmul.f32 %v1464_v35, %v1810_v52  ;;  %v1030_v37 = vpop.xlane.xlu1 %1029 }
 0x30d   : > { %1473 = vrcp.f32 %v1030_v37  ;;  %v1024_v38 = vpop.xlane.xlu0 %1023 }
 0x30e   : > { %1073 = vst [vmem:[%s1866_s21] sm:$0xff] %v1057_v36  ;;  %1475 = vrcp.f32 %v1024_v38 }
 0x30f   : > { %v1466_v32 = vpop.eup %1465 }
 0x310   : > { %v1468_v39 = vpop.eup %1467  ;;  %v1063_v40 = vmul.f32 %v1466_v32, %v1815_v59  ;;  %v1026_v41 = vpop.xlane.xlu1 %1025 }
 0x311   : > { %v1060_v42 = vmul.f32 %v1468_v39, %v1817_v61  ;;  %1477 = vrcp.f32 %v1026_v41  ;;  %v1020_v43 = vpop.xlane.xlu0 %1019 }
 0x312   : > { %1079 = vst [vmem:[%s1866_s21 + $0x30] sm:$0xff] %v1063_v40  ;;  %1479 = vrcp.f32 %v1020_v43 }
 0x313   : > { %v1470_v44 = vpop.eup %1469  ;;  %1076 = vst [vmem:[%s1866_s21 + $0x18] sm:$0xff] %v1060_v42 }
 0x314   : > { %v1472_v45 = vpop.eup %1471  ;;  %v1061_v46 = vmul.f32 %v1470_v44, %v1823_v3 }
 0x315   : > { %v1058_v47 = vmul.f32 %v1472_v45, %v1825_v4  ;;  %v1032_v48 = vpop.xlane.xlu0 %1031  ;;  %v1034_v49 = vpop.xlane.xlu1 %1033 }
 0x316   : > { %1077 = vst [vmem:[%s1866_s21 + $0x20] sm:$0xff] %v1061_v46  ;;  %1481 = vrcp.f32 %v1032_v48 }
 0x317   : > { %v1474_v50 = vpop.eup %1473  ;;  %1074 = vst [vmem:[%s1866_s21 + $0x8] sm:$0xff] %v1058_v47  ;;  %1483 = vrcp.f32 %v1034_v49 }
 0x318   : > { %v1476_v51 = vpop.eup %1475  ;;  %v1067_v52 = vmul.f32 %v1474_v50, %v1831_v11 }
 0x319   : > { %v1064_v53 = vmul.f32 %v1476_v51, %v1833_v12  ;;  %v1028_v54 = vpop.xlane.xlu0 %1027  ;;  %v1038_v55 = vpop.xlane.xlu1 %1037 }
 0x31a   : > { %1083 = vst [vmem:[%s1866_s21 + $0x50] sm:$0xff] %v1067_v52  ;;  %1485 = vrcp.f32 %v1028_v54 }
 0x31b   : > { %v1478_v56 = vpop.eup %1477  ;;  %1080 = vst [vmem:[%s1866_s21 + $0x38] sm:$0xff] %v1064_v53  ;;  %1487 = vrcp.f32 %v1038_v55 }
 0x31c   : > { %v1480_v57 = vpop.eup %1479  ;;  %v1065_v58 = vmul.f32 %v1478_v56, %v1838_v17 }
 0x31d   : > { %v1062_v59 = vmul.f32 %v1480_v57, %v1840_v18  ;;  %v1036_v60 = vpop.xlane.xlu0 %1035 }
 0x31e   : > { %1081 = vst [vmem:[%s1866_s21 + $0x40] sm:$0xff] %v1065_v58  ;;  %1489 = vrcp.f32 %v1036_v60 }
 0x31f   : > { %1078 = vst [vmem:[%s1866_s21 + $0x28] sm:$0xff] %v1062_v59 }
 0x320   : > { %v1482_v61 = vpop.eup %1481 }
 0x321   : > { %v1484_v62 = vpop.eup %1483  ;;  %v1068_v63 = vmul.f32 %v1482_v61, %v1844_v20  ;;  %v1040_v0 = vpop.xlane.xlu0 %1039 }
 0x322   : > { %v1069_v1 = vmul.f32 %v1484_v62, %v1846_v21  ;;  %1491 = vrcp.f32 %v1040_v0 }
 0x323   : > { %1084 = vst [vmem:[%s1866_s21 + $0x58] sm:$0xff] %v1068_v63 }
 0x324   : > { %v1486_v2 = vpop.eup %1485  ;;  %1085 = vst [vmem:[%s1866_s21 + $0x60] sm:$0xff] %v1069_v1 }
 0x325   : > { %v1488_v3 = vpop.eup %1487  ;;  %v1066_v4 = vmul.f32 %v1486_v2, %v1850_v22 }
 0x326   : > { %v1071_v5 = vmul.f32 %v1488_v3, %v1852_v23 }
 0x327   : > { %1082 = vst [vmem:[%s1866_s21 + $0x48] sm:$0xff] %v1066_v4 }
 0x328   : > { %v1490_v6 = vpop.eup %1489  ;;  %1087 = vst [vmem:[%s1866_s21 + $0x70] sm:$0xff] %v1071_v5 }
 0x329   : > { %v1070_v7 = vmul.f32 %v1490_v6, %v1856_v24 }
 0x32b   : > { %1086 = vst [vmem:[%s1866_s21 + $0x68] sm:$0xff] %v1070_v7 }
 0x32c   : > { %v1492_v8 = vpop.eup %1491 }
 0x32d   : > { %v1072_v9 = vmul.f32 %v1492_v8, %v1859_v25 }
 0x32f   : > { %1088 = vst [vmem:[%s1866_s21 + $0x78] sm:$0xff] %v1072_v9 }
 0x330   : > { %1506 = shalt.err (!%p1503_p3)
}
 0x331   : > { %s1507_s17 = scalar_lea.hbm %s1902_s13, 2048  ;;  %s1511_s20 = scalar_lea.hbm %s1958_s7, 4096 }
 0x332   : > { %p1508_p4 = scmp.ne.s32.totalorder %s1902_s13, %s1507_s17  ;;  %p1512_p9 = scmp.lt.u32.totalorder %s1902_s13, %s1958_s7 }
 0x333   : > { %p1513_p10 = scmp.lt.u32.totalorder %s1511_s20, %s1507_s17  ;;  %p1515_p12 = scmp.lt.u32.totalorder %s1507_s17, %s1902_s13 }
 0x334   : > { %p1509_p7 = pnand %p1508_p4, %p1640_p5 }
 0x335   : > { %p1514_p11 = por %p1513_p10, %p1512_p9 }
 0x336   : > { %p1510_p8 = pneg %p1509_p7 }
 0x337   : > { %p1516_p13 = por %p1515_p12, %p1514_p11 }
 0x339   : > { %p1517_p0 = pnand %p1516_p13, %p1510_p8 }
 0x33b   : > { %1520 = shalt.err (!%p1517_p0)
}
 0x33c   : > { %s1560_s8 = smov 128   ;;  %s1561_s9 = smov 8  }
 0x33d   : > { %1374 = dma.vmem_to_hbm [thread:$0]  (%p1640_p5), %s1904_s23, 2048, %s1902_s13, %s1910_s14, %s1560_s8, %s1560_s8, %s1561_s9  }
 0x33e PF: > { %p1380_p1 = scmp.ge.s32.totalorder %s1555_s27, 2  ;;  %s1118_s28 = sand.u32 1, %s1543_s24  }
 0x33f   : > { %s1119_s15 = scalar_lea.sflag [#allocation3], %s1118_s28 }
 0x340   : > { %p1377_p2 = pnand %p1380_p1, %p1644_p6 }
 0x342   : > { %1538 = dma.done.wait (!%p1377_p2), %s1119_s15, 2048  }
 0x343   : > { %1540 = vsyncadd (!%p1377_p2), %s1119_s15, 4294965248  ;;  %p17_p3 = scmp.ge.s32.totalorder %s1627_s30, 4   ;;  %s1961_s24 = smov %s1547_s25 }
 0x344   : > { %s1962_s25 = smov %s1551_s26  ;;  %s1963_s26 = smov %s1638_s10 }
 0x345   : > { %s1964_s27 = smov %s1627_s30  ;;  %19 = sbr.rel (!%p17_p3) target bundleno = 3 (0x3), region = 86 }
 0x34c   :  { %1124 = vsyncpa [#allocation3], 1 }
 0x34d   :  { %1126 = vsyncpa [#allocation3 + $0x1], 1 }

</bundles_post_ra>
